<compile_context>
chip_gen: v7x
topology: tpu7x:2x2x1
jax: 0.10.0
libtpu: 0.0.40
codegen_flags: <defaults>
</compile_context>

<pallas_src>
import functools

import jax
import jax.numpy as jnp
from jax import lax
from jax.experimental import pallas as pl
from jax.experimental.pallas import tpu as pltpu

_LANES = 128
_TARGET_ROWS = 4096   # (4096,128) f32 tile = 2 MiB per pipeline buffer
_CHUNK_ROWS = 512     # in-kernel sub-chunk: bounds live f32 temporaries to ~256 KiB each

# Neutral sentinels: logit=+80 with target=1 gives a per-element contribution of
# log1p(exp(-80)) * (1 - exp(~-20)) ~= 1.8e-35, i.e. exactly 0 at f32 precision.
_PAD_LOGIT = 80.0
_PAD_TARGET = 1.0


def _round_up(x, m):
    return ((x + m - 1) // m) * m


def _sublane(dtype):
    return {4: 8, 2: 16, 1: 32}.get(jnp.dtype(dtype).itemsize, 8)


def _bce_blur_kernel(pred_ref, true_ref, out_ref, *, inv_alpha, valid_rows, chunk_rows):
    s = pl.program_id(0)          # split ("parallel" -> 2 TCs on v7x)
    t = pl.program_id(1)          # tile within split ("arbitrary", accumulating)

    @pl.when(t == 0)
    def _():
        out_ref[...] = jnp.zeros_like(out_ref)

    row_tile = pred_ref.shape[0]
    # Logical (unclamped) first row of this tile; only used for the validity mask.
    tile_row0 = (s * pl.num_programs(1) + t) * row_tile

    # Hoisted once per tile: JAX does not CSE broadcast/iota inside loops.
    chunk_iota = lax.broadcasted_iota(jnp.int32, (chunk_rows, _LANES), 0)

    def chunk_partial(r0, nrows, row_iota):
        x = pred_ref[pl.ds(r0, nrows), :].astype(jnp.float32)
        y = true_ref[pl.ds(r0, nrows), :].astype(jnp.float32)

        # Clamp INPUTS of out-of-range rows (grid-edge / split overshoot) to the
        # neutral sentinels BEFORE the exp/log chain, so garbage rows (which may
        # hold Inf/NaN bit patterns) contribute ~0 instead of NaN.
        limit = valid_rows - (tile_row0 + r0)          # scalar, >= nrows for interior tiles
        valid = row_iota < limit
        x = jnp.where(valid, x, _PAD_LOGIT)
        y = jnp.where(valid, y, _PAD_TARGET)

        # Numerically-stable BCE-with-logits; exp(-|x|) is reused by the sigmoid
        # (one fewer EUP transcendental per element).
        e = jnp.exp(-jnp.abs(x))
        bce = jnp.maximum(x, 0.0) - x * y + jnp.log1p(e)
        p = jnp.where(x >= 0.0, 1.0, e) / (1.0 + e)    # sigmoid(x), exact divide
        alpha_factor = 1.0 - jnp.exp((p - y - 1.0) * inv_alpha)
        w = bce * alpha_factor

        # Fold (nrows,128) into an (8,128) vreg of partial sums with pure VPU adds.
        return jnp.sum(w.reshape(nrows // 8, 8, _LANES), axis=0)

    n_full = row_tile // chunk_rows
    rem = row_tile - n_full * chunk_rows               # multiple of the sublane count

    def body(c, acc):
        r0 = pl.multiple_of(c * chunk_rows, chunk_rows)
        return acc + chunk_partial(r0, chunk_rows, chunk_iota)

    acc = lax.fori_loop(0, n_full, body, jnp.zeros((8, _LANES), jnp.float32),
                        unroll=True)
    if rem:
        acc = acc + chunk_partial(n_full * chunk_rows, rem, chunk_iota[:rem])

    out_ref[...] += acc


def bce_blur_with_logits_loss(pred, true, alpha=0.05, *, target_rows=_TARGET_ROWS):
    """Scalar f32: mean(BCEWithLogits(pred, true) * (1 - exp((sigmoid(pred)-true-1)/(alpha+1e-4))))."""
    assert pred.shape == true.shape
    n = pred.size
    inv_alpha = 1.0 / (float(alpha) + 1e-4)

    sub = max(_sublane(pred.dtype), _sublane(true.dtype))
    rows = pl.cdiv(n, _LANES)
    rows_pad = _round_up(rows, sub)                    # pad granularity: sub*128 elems
    total_pad = rows_pad * _LANES

    # 2-way leading split whenever there are >= 2 minimal tiles of work: v7x's two
    # TensorCores each take half; on v5e/v6e it is just one extra (cheap) loop dim.
    n_splits = 2 if rows_pad >= 2 * sub else 1
    rows_per_split = _round_up(pl.cdiv(rows_pad, n_splits), sub)
    row_tile = min(_round_up(target_rows, sub), rows_per_split)
    tiles_per_split = pl.cdiv(rows_per_split, row_tile)
    num_tiles = pl.cdiv(rows_pad, row_tile)            # blocks that exist in the slab
    chunk_rows = min(_CHUNK_ROWS, row_tile)

    def _prep(a, pad_value):
        flat = jnp.ravel(a)                            # free for contiguous inputs
        if total_pad != n:
            # Ragged tail only: <= sub*128-1 sentinel elements (one small fused copy).
            flat = jnp.pad(flat, (0, total_pad - n), constant_values=pad_value)
        return flat.reshape(rows_pad, _LANES)

    pred2d = _prep(pred, _PAD_LOGIT)
    true2d = _prep(true, _PAD_TARGET)

    kernel = functools.partial(_bce_blur_kernel, inv_alpha=inv_alpha,
                               valid_rows=rows_pad, chunk_rows=chunk_rows)

    def in_map(s, t):
        # Clamp so overshoot tiles of the second split never index past the slab;
        # their rows are logically >= rows_pad and get masked in-kernel anyway.
        return (jnp.minimum(s * tiles_per_split + t, num_tiles - 1), 0)

    bytes_in = n * (jnp.dtype(pred.dtype).itemsize + jnp.dtype(true.dtype).itemsize)
    cost = pl.CostEstimate(flops=20 * n, transcendentals=3 * n,
                           bytes_accessed=bytes_in + n_splits * 8 * _LANES * 4)

    partials = pl.pallas_call(
        kernel,
        out_shape=jax.ShapeDtypeStruct((n_splits * 8, _LANES), jnp.float32),
        grid_spec=pltpu.PrefetchScalarGridSpec(
            num_scalar_prefetch=0,
            grid=(n_splits, tiles_per_split),
            in_specs=[
                pl.BlockSpec((row_tile, _LANES), in_map),
                pl.BlockSpec((row_tile, _LANES), in_map),
            ],
            out_specs=pl.BlockSpec((8, _LANES), lambda s, t: (s, 0)),
        ),
        compiler_params=pltpu.CompilerParams(
            dimension_semantics=("parallel", "arbitrary"),
            # 2 inputs x 2 buffers x 2 MiB (f32 @ 4096 rows) + chunk temps ~= 10 MiB;
            # raise the scoped limit explicitly so v5e's 16 MiB default has headroom.
            vmem_limit_bytes=32 * 1024 * 1024,
        ),
        cost_estimate=cost,
    )(pred2d, true2d)

    # Final cross-lane reduce + divide once, in the wrapper.
    return jnp.sum(partials) / jnp.float32(n)


def _reference(pred, true, alpha=0.05):
    x = pred.astype(jnp.float32)
    y = true.astype(jnp.float32)
    bce = jnp.maximum(x, 0.0) - x * y + jnp.log1p(jnp.exp(-jnp.abs(x)))
    p = jax.nn.sigmoid(x)
    alpha_factor = 1.0 - jnp.exp((p - y - 1.0) / (alpha + 1e-4))
    return jnp.mean(bce * alpha_factor)


if __name__ == "__main__":
    key = jax.random.PRNGKey(0)

    cases = [
        # (shape, dtype, kwargs)
        ((2, 4, 16, 16), jnp.float32, {}),                   # aligned: no pad, 2-way split
        ((3, 3, 20, 20), jnp.float32, {}),                   # ragged: small sentinel pad
        ((2, 36, 128),   jnp.float32, {"target_rows": 16}),  # partial-mask + clamped overshoot tile
        ((3, 400, 128),  jnp.float32, {}),                   # chunk-remainder path inside the tile
        ((2, 4, 16, 16), jnp.bfloat16, {}),                  # bf16 inputs (sublane=16 path)
    ]

    for i, (shape, dtype, kw) in enumerate(cases):
        kp, kt = jax.random.split(jax.random.fold_in(key, i))
        pred = (jax.random.normal(kp, shape, dtype=jnp.float32) * 2.0).astype(dtype)
        true = (jax.random.uniform(kt, shape) > 0.5).astype(dtype)

        fn = jax.jit(functools.partial(bce_blur_with_logits_loss, **kw))
        loss = jax.block_until_ready(fn(pred, true))
        ref = _reference(pred, true)
        assert jnp.allclose(loss, ref, rtol=1e-4, atol=1e-6), (shape, dtype, loss, ref)

    print("KERNEL_OK")
</pallas_src>

<mosaic_0001>
module attributes {stable_mosaic.version = 11 : i64} {
  func.func @_bce_blur_kernel(%arg0: i32, %arg1: i32, %arg2: memref<8x128xf32, #tpu.memory_space<vmem>>, %arg3: memref<8x128xf32, #tpu.memory_space<vmem>>, %arg4: memref<8x128xf32, #tpu.memory_space<vmem>>) attributes {dimension_semantics = [#tpu.dimension_semantics<parallel>, #tpu.dimension_semantics<arbitrary>], iteration_bounds = array<i64: 2, 1>, scalar_prefetch = 0 : i64, scratch_operands = 0 : i64, tpu.core_type = #tpu.core_type<tc>, window_params = [{transform_indices = @transform_0, window_bounds = array<i64: 8, 128>}, {transform_indices = @transform_1, window_bounds = array<i64: 8, 128>}, {transform_indices = @transform_2, window_bounds = array<i64: 8, 128>}]} {
    %c0_i32 = arith.constant 0 : i32
    %0 = arith.cmpi eq, %arg1, %c0_i32 : i32
    %1 = arith.extui %0 : i1 to i32
    %c0_i32_0 = arith.constant 0 : i32
    %2 = arith.cmpi ne, %1, %c0_i32_0 : i32
    scf.if %2 {
      %cst_20 = arith.constant 0.000000e+00 : f32
      %54 = vector.broadcast %cst_20 : f32 to vector<8x128xf32>
      %c0_21 = arith.constant 0 : index
      %c0_22 = arith.constant 0 : index
      %55 = vector.load %arg4[%c0_21, %c0_22] : memref<8x128xf32, #tpu.memory_space<vmem>>, vector<8x128xf32>
      tpu.vector_store %arg4[%c0_21, %c0_22], %54 {strides = array<i32>} : memref<8x128xf32, #tpu.memory_space<vmem>>, vector<8x128xf32>,
    } else {
    }
    %c1_i32 = arith.constant 1 : i32
    %3 = arith.muli %arg0, %c1_i32 : i32
    %4 = arith.addi %3, %arg1 : i32
    %c8_i32 = arith.constant 8 : i32
    %5 = arith.muli %4, %c8_i32 : i32
    %6 = tpu.iota {dimensions = array<i32: 0>} : vector<8x128xi32>
    %cst = arith.constant 0.000000e+00 : f32
    %7 = vector.broadcast %cst : f32 to vector<8x128xf32>
    %c0_i32_1 = arith.constant 0 : i32
    %c8_i32_2 = arith.constant 8 : i32
    %8 = arith.muli %c0_i32_1, %c8_i32_2 : i32
    %9 = tpu.assume_multiple %8, 8 : i32
    %10 = arith.index_cast %9 : i32 to index
    %c0 = arith.constant 0 : index
    %11 = vector.load %arg2[%10, %c0] : memref<8x128xf32, #tpu.memory_space<vmem>>, vector<8x128xf32>
    %12 = arith.index_cast %9 : i32 to index
    %c0_3 = arith.constant 0 : index
    %13 = vector.load %arg3[%12, %c0_3] : memref<8x128xf32, #tpu.memory_space<vmem>>, vector<8x128xf32>
    %14 = arith.addi %5, %9 : i32
    %c16_i32 = arith.constant 16 : i32
    %15 = arith.subi %c16_i32, %14 : i32
    %16 = vector.broadcast %15 : i32 to vector<8x128xi32>
    %17 = arith.cmpi slt, %6, %16 : vector<8x128xi32>
    %cst_4 = arith.constant 8.000000e+01 : f32
    %18 = vector.broadcast %cst_4 : f32 to vector<8x128xf32>
    %19 = arith.select %17, %11, %18 : vector<8x128xi1>, vector<8x128xf32>
    %cst_5 = arith.constant 1.000000e+00 : f32
    %20 = vector.broadcast %cst_5 : f32 to vector<8x128xf32>
    %21 = arith.select %17, %13, %20 : vector<8x128xi1>, vector<8x128xf32>
    %22 = math.absf %19 : vector<8x128xf32>
    %cst_6 = arith.constant 0.000000e+00 : f32
    %23 = vector.broadcast %cst_6 : f32 to vector<8x128xf32>
    %24 = arith.subf %23, %22 : vector<8x128xf32>
    %25 = math.exp %24 : vector<8x128xf32>
    %cst_7 = arith.constant 0.000000e+00 : f32
    %26 = vector.broadcast %cst_7 : f32 to vector<8x128xf32>
    %27 = arith.maximumf %19, %26 : vector<8x128xf32>
    %28 = arith.mulf %19, %21 : vector<8x128xf32>
    %29 = arith.subf %27, %28 : vector<8x128xf32>
    %30 = math.log1p %25 : vector<8x128xf32>
    %31 = arith.addf %29, %30 : vector<8x128xf32>
    %cst_8 = arith.constant 0.000000e+00 : f32
    %32 = vector.broadcast %cst_8 : f32 to vector<8x128xf32>
    %33 = arith.cmpf oge, %19, %32 : vector<8x128xf32>
    %cst_9 = arith.constant 1.000000e+00 : f32
    %34 = vector.broadcast %cst_9 : f32 to vector<8x128xf32>
    %35 = arith.select %33, %34, %25 : vector<8x128xi1>, vector<8x128xf32>
    %cst_10 = arith.constant 1.000000e+00 : f32
    %36 = vector.broadcast %cst_10 : f32 to vector<8x128xf32>
    %37 = arith.addf %36, %25 : vector<8x128xf32>
    %38 = arith.divf %35, %37 : vector<8x128xf32>
    %39 = arith.subf %38, %21 : vector<8x128xf32>
    %cst_11 = arith.constant 1.000000e+00 : f32
    %40 = vector.broadcast %cst_11 : f32 to vector<8x128xf32>
    %41 = arith.subf %39, %40 : vector<8x128xf32>
    %cst_12 = arith.constant 19.9600792 : f32
    %42 = vector.broadcast %cst_12 : f32 to vector<8x128xf32>
    %43 = arith.mulf %41, %42 : vector<8x128xf32>
    %44 = math.exp %43 : vector<8x128xf32>
    %cst_13 = arith.constant 1.000000e+00 : f32
    %45 = vector.broadcast %cst_13 : f32 to vector<8x128xf32>
    %46 = arith.subf %45, %44 : vector<8x128xf32>
    %47 = arith.mulf %31, %46 : vector<8x128xf32>
    %48 = vector.shape_cast %47 : vector<8x128xf32> to vector<1x8x128xf32>
    %cst_14 = arith.constant dense<0.000000e+00> : vector<8x128xf32>
    %49 = vector.multi_reduction <add>, %48, %cst_14 [0] : vector<1x8x128xf32> to vector<8x128xf32>
    %50 = arith.addf %7, %49 : vector<8x128xf32>
    %c1_i32_15 = arith.constant 1 : i32
    %c0_16 = arith.constant 0 : index
    %c0_17 = arith.constant 0 : index
    %51 = vector.load %arg4[%c0_16, %c0_17] : memref<8x128xf32, #tpu.memory_space<vmem>>, vector<8x128xf32>
    %52 = arith.addf %51, %50 : vector<8x128xf32>
    %c0_18 = arith.constant 0 : index
    %c0_19 = arith.constant 0 : index
    %53 = vector.load %arg4[%c0_18, %c0_19] : memref<8x128xf32, #tpu.memory_space<vmem>>, vector<8x128xf32>
    tpu.vector_store %arg4[%c0_18, %c0_19], %52 {strides = array<i32>} : memref<8x128xf32, #tpu.memory_space<vmem>>, vector<8x128xf32>,
    return
  }
  func.func @transform_0(%arg0: i32, %arg1: i32) -> (i32, i32) {
    %c1_i32 = arith.constant 1 : i32
    %0 = arith.muli %arg0, %c1_i32 : i32
    %1 = arith.addi %0, %arg1 : i32
    %c1_i32_0 = arith.constant 1 : i32
    %2 = arith.minsi %1, %c1_i32_0 : i32
    %c0_i32 = arith.constant 0 : i32
    %c0_i32_1 = arith.constant 0 : i32
    return %2, %c0_i32 : i32, i32
  }
  func.func @transform_1(%arg0: i32, %arg1: i32) -> (i32, i32) {
    %c1_i32 = arith.constant 1 : i32
    %0 = arith.muli %arg0, %c1_i32 : i32
    %1 = arith.addi %0, %arg1 : i32
    %c1_i32_0 = arith.constant 1 : i32
    %2 = arith.minsi %1, %c1_i32_0 : i32
    %c0_i32 = arith.constant 0 : i32
    %c0_i32_1 = arith.constant 0 : i32
    return %2, %c0_i32 : i32, i32
  }
  func.func @transform_2(%arg0: i32, %arg1: i32) -> (i32, i32) {
    %c0_i32 = arith.constant 0 : i32
    %c0_i32_0 = arith.constant 0 : i32
    return %arg0, %c0_i32 : i32, i32
  }
}

</mosaic_0001>

<bundles_post_ra>
// kernel: bce_blur_with_logits_loss.1
= control target key start
LH: loop header
LB: loop body
LE: loop exit
PB: predicated region body
PF: predicated region fallthrough
CT: control target
= control target key end

     0   :  { %s424_s9 = smov 0   ;;  %s426_s10 = smov 0   ;;  %s472_s0 = inlined_call_operand.vmem [shape: f32[16,128], index: 0, kind: input, shape index: {}]   ;;  %s473_s1 = inlined_call_operand.vmem [shape: f32[16,128], index: 1, kind: input, shape index: {}]   ;;  %s474_s2 = inlined_call_operand.vmem [shape: f32[16,128], index: 2, kind: output, shape index: {}]  }
   0x1   :  { %s428_s11 = smov 0  }
   0x2 LB: > { %s24_s12 = sadd.s32 1, %s403_s10  ;;  %p338_p0 = scmp.ge.s32.totalorder %s407_s11, 1  ;;  %s407_s11 = sphi %s428_s11, %s12_s11   ;;  %s403_s10 = sphi %s426_s10, %s478_s10   ;;  %s399_s9 = sphi %s424_s9, %s477_s9  }
   0x3   : > { %p26_p1 = scmp.ge.s32.totalorder %s24_s12, 2  ;;  %p156_p2 = scmp.lt.s32.totalorder %s407_s11, 3 }
   0x5   : > { %s480_s12 = smov (%p26_p1, %s24_s12), 0  ;;  %p157_p3 = pnand %p338_p0, %p156_p2 }
   0x6   : > { %p187_p4 = scmp.lt.s32.totalorder (!%p157_p3), %s399_s9, 1  ;;  %s348_s13 = sshll.u32 (!%p157_p3), %s399_s9, 3  ;;  %v217_v0 = vlaneseq (!%p157_p3) }
   0x7   : > { %160 = sbr.rel (%p157_p3) target bundleno = 77 (0x4d), region = 28  ;;  %s222_s14 = ssub.s32 (!%p157_p3), 16, %s348_s13 }
   0x8   : > { %v218_v1 = vshrl.u32 (!%p157_p3), %v217_v0, 7  ;;  %v223_v2 = vstv (!%p157_p3), %s222_s14 }
   0xa   : > { %vm445_vm0 = vcmp.lt.s32.totalorder (!%p157_p3), %v218_v1, %v223_v2 }
   0xe   : > { %s482_s9 = smov (!%p187_p4, %s399_s9), 1 }
   0xf   : > { %s190_s15 = scalar_select %p187_p4, %s482_s9, 1 }
  0x10   : > { %s347_s23 = sshll.u32 %s482_s9, 3 }
  0x11   : > { %s342_s16 = sshll.u32 %s190_s15, 3  ;;  %s209_s26 = scalar_lea.vmem %s474_s2, %s347_s23 }
  0x12   : > { %s192_s19 = scalar_lea.vmem %s472_s0, %s342_s16  ;;  %s202_s22 = scalar_lea.vmem %s473_s1, %s342_s16 }
  0x13   : > { %v219_v4 = vld [vmem:[%s192_s19] sm:$0xff] }
  0x14   : > { %v225_v5 = vsel %vm445_vm0, %v219_v4, 80.0  ;;  %v220_v11 = vld [vmem:[%s202_s22] sm:$0xff] }
  0x15   : > { %v227_v6 = vand.u32 2147483647, %v225_v5  ;;  %vm244_vm1 = vcmp.ge.f32.partialorder %v225_v5, 0.0  ;;  %v226_v14 = vsel %vm445_vm0, %v220_v11, 1.0  ;;  %v231_v25 = vmax.f32 %v225_v5, 0.0 }
  0x16   : > { %v232_v24 = vmul.f32 %v226_v14, %v225_v5 }
  0x17   : > { %v228_v7 = vsub.f32 0.0, %v227_v6 }
  0x18   : > { %v233_v28 = vsub.f32 %v231_v25, %v232_v24 }
  0x19   : > { %v229_v8 = vmul.f32 1.442695, %v228_v7 }
  0x1b   : > { %377 = vpow2.f32 %v229_v8 }
  0x25   : > { %v378_v9 = vpop.eup %377 }
  0x26   : > { %v234_v10 = vadd.f32 1.0, %v378_v9  ;;  %v245_v12 = vsel %vm244_vm1, 1.0, %v378_v9  ;;  %v237_v18 = vmul.f32 -0.5, %v378_v9  ;;  %v240_v23 = vand.u32 2147483647, %v378_v9 }
  0x28   : > { %379 = vrcp.f32 %v234_v10  ;;  %v238_v21 = vadd.f32 1.0, %v237_v18  ;;  %vm241_vm2 = vcmp.lt.f32.partialorder %v240_v23, 0.0004427343 }
  0x29   : > { %381 = vlog2.f32 %v234_v10 }
  0x2a   : > { %v239_v27 = vmul.f32 %v378_v9, %v238_v21 }
  0x32   : > { %v380_v13 = vpop.eup %379 }
  0x33   : > { %v248_v15 = vmul.f32 %v380_v13, %v245_v12  ;;  %v382_v22 = vpop.eup %381 }
  0x34   : > { %v236_v26 = vmul.f32 0.6931472, %v382_v22 }
  0x35   : > { %v249_v16 = vsub.f32 %v248_v15, %v226_v14 }
  0x36   : > { %v242_v29 = vsel %vm241_vm2, %v239_v27, %v236_v26 }
  0x37   : > { %v349_v17 = vadd.f32 -1.0, %v249_v16  ;;  %v243_v30 = vadd.f32 %v242_v29, %v233_v28 }
  0x39   : > { %v251_v19 = vmul.f32 19.96008, %v349_v17 }
  0x3b   : > { %v252_v20 = vmul.f32 1.442695, %v251_v19 }
  0x3d   : > { %383 = vpow2.f32 %v252_v20 }
  0x47   : > { %v384_v31 = vpop.eup %383 }
  0x48   : > { %v254_v32 = vsub.f32 1.0, %v384_v31 }
  0x4a   : > { %v255_v33 = vmul.f32 %v254_v32, %v243_v30 }
  0x4c   : > { %260 = vst [vmem:[%s209_s26] sm:$0xff] %v255_v33 }
  0x4d PF: > { %s12_s11 = sadd.s32 1, %s407_s11   ;;  %s477_s9 = smov %s403_s10 }
  0x4e   : > { %p9_p5 = scmp.ge.s32.totalorder %s12_s11, 4   ;;  %s478_s10 = smov %s480_s12 }
  0x50   :  { %11 = sbr.rel (!%p9_p5) target bundleno = 2 (0x2), region = 65 }

</bundles_post_ra>
